<compile_context>
chip_gen: v7x
topology: tpu7x:2x2x1
jax: 0.10.0
libtpu: 0.0.40
codegen_flags: <defaults>
</compile_context>

<pallas_src>
import jax
import jax.numpy as jnp
from jax import lax
from jax.experimental import pallas as pl
from jax.experimental.pallas import tpu as pltpu


_LANE = 128
_DEFAULT_VMEM_BUDGET = 40 * 1024 * 1024   # tile-footprint budget (v7x-safe)
_VMEM_LIMIT_BYTES = 48 * 1024 * 1024      # scoped VMEM limit we request


def _round_up(a, m):
    return ((a + m - 1) // m) * m


def _cdiv(a, b):
    return (a + b - 1) // b


def _balanced_tile(dim, cap, mult):
    """Split `dim` into equal tiles <= cap, each a multiple of `mult`.

    Returns (tile, padded_dim), padded_dim = tile * n_tiles >= dim.  Balancing
    (instead of round_up(dim, cap)) avoids paying up to a whole tile of zero
    padding when `dim` is just over a tile boundary.
    """
    rounded = _round_up(max(dim, 1), mult)
    n_tiles = _cdiv(rounded, cap)
    tile = _round_up(_cdiv(rounded, n_tiles), mult)
    return tile, tile * n_tiles


def _linear_fused_kernel(x_ref, w_ref, b_ref, o_ref):
    # Whole K reduction in one step: dot + bias straight into the output tile.
    # x_ref: (tm, K)  w_ref: (tn, K)  b_ref: (1, tn)  o_ref: (tm, tn)
    acc = lax.dot_general(
        x_ref[...],
        w_ref[...],
        dimension_numbers=(((1,), (1,)), ((), ())),   # NT: contract last dims
        preferred_element_type=jnp.float32,
    )
    o_ref[...] = (acc + b_ref[...].astype(jnp.float32)).astype(o_ref.dtype)


def _linear_ksplit_kernel(x_ref, w_ref, b_ref, o_ref, acc_ref):
    # K-split fallback: f32 accumulator resident across the K grid axis.
    k = pl.program_id(2)

    @pl.when(k == 0)
    def _init():
        acc_ref[...] = jnp.zeros_like(acc_ref)

    acc_ref[...] += lax.dot_general(
        x_ref[...],
        w_ref[...],
        dimension_numbers=(((1,), (1,)), ((), ())),
        preferred_element_type=jnp.float32,
    )

    @pl.when(k == pl.num_programs(2) - 1)
    def _finalize():
        o_ref[...] = (acc_ref[...] + b_ref[...].astype(jnp.float32)).astype(
            o_ref.dtype
        )


def linear_logsoftmax_forward(x, weight, bias, *, compute_dtype=None,
                              vmem_budget_bytes=_DEFAULT_VMEM_BUDGET):
    """Pallas implementation of nn.Linear(input_dim, nclass) forward.

    x:      [batch, input_dim]
    weight: [nclass, input_dim]   (PyTorch convention, used as-is — no .T copy)
    bias:   [nclass]
    compute_dtype: optional MXU operand dtype (e.g. jnp.bfloat16); accumulation
                   stays f32.  Output is returned in x's original dtype.
    """
    batch, input_dim = x.shape
    nclass, k2 = weight.shape
    assert k2 == input_dim, "weight/input_dim mismatch"
    out_dtype = x.dtype

    # NOTE: in a real model, pre-cast/pre-pad the static weight & bias once at
    # parameter-setup time so these copies are not paid on every forward call.
    if compute_dtype is not None:
        x = x.astype(compute_dtype)
        weight = weight.astype(compute_dtype)

    in_itemsize = jnp.dtype(x.dtype).itemsize
    out_itemsize = jnp.dtype(out_dtype).itemsize
    bias_itemsize = jnp.dtype(bias.dtype).itemsize
    # dtype-aware sublane multiple: 8 rows (f32), 16 (bf16), 32 (int8/fp8).
    m_mult = max(8, 32 // in_itemsize)

    # --- M / N tiles: balanced against padding waste, caps at 512. ---------
    tm, mp = _balanced_tile(batch, 512, m_mult)
    tn, np_ = _balanced_tile(nclass, 512, _LANE)

    # --- Keep >=2 parallel tiles so v7x's second TensorCore has work. ------
    if (mp // tm) * (np_ // tn) == 1:
        if mp >= 2 * m_mult:
            tm = _round_up(_cdiv(mp, 2), m_mult)
            mp = 2 * tm
        elif np_ >= 2 * _LANE:
            tn = _round_up(_cdiv(np_, 2), _LANE)
            np_ = 2 * tn

    # --- K: collapse the reduction to one step if it fits the VMEM budget. -
    kp_full = _round_up(input_dim, _LANE)

    def _footprint(tk, with_acc):
        f = 2 * (tm * tk + tn * tk) * in_itemsize       # double-buffered inputs
        f += 2 * tm * tn * out_itemsize                 # double-buffered output
        f += 2 * tn * bias_itemsize                     # bias
        if with_acc:
            f += tm * tn * 4                            # f32 accumulator scratch
        return f

    single_k = _footprint(kp_full, with_acc=False) <= vmem_budget_bytes
    if single_k:
        tk, kp = kp_full, kp_full
    else:
        fixed = _footprint(0, with_acc=True)
        tk_cap = (vmem_budget_bytes - fixed) // (2 * (tm + tn) * in_itemsize)
        tk_cap = max(_LANE, (tk_cap // _LANE) * _LANE)
        tk, kp = _balanced_tile(input_dim, tk_cap, _LANE)

    # --- Zero-pad operands to the padded tile grid (padded K columns and ---
    # --- bias columns contribute 0; padded rows/cols are sliced off).    ---
    if (mp, kp) != (batch, input_dim):
        x = jnp.pad(x, ((0, mp - batch), (0, kp - input_dim)))
    if (np_, kp) != (nclass, input_dim):
        weight = jnp.pad(weight, ((0, np_ - nclass), (0, kp - input_dim)))
    b2 = bias.reshape(1, nclass)
    if np_ != nclass:
        b2 = jnp.pad(b2, ((0, 0), (0, np_ - nclass)))

    cost = pl.CostEstimate(
        flops=2 * mp * np_ * kp,
        bytes_accessed=(mp * kp + np_ * kp) * in_itemsize
        + mp * np_ * out_itemsize
        + np_ * bias_itemsize,
        transcendentals=0,
    )

    if single_k:
        grid = (mp // tm, np_ // tn)
        compiler_params = pltpu.CompilerParams(
            dimension_semantics=("parallel", "parallel"),
            vmem_limit_bytes=_VMEM_LIMIT_BYTES,
        )
        out_padded = pl.pallas_call(
            _linear_fused_kernel,
            out_shape=jax.ShapeDtypeStruct((mp, np_), out_dtype),
            grid_spec=pltpu.PrefetchScalarGridSpec(
                num_scalar_prefetch=0,
                grid=grid,
                in_specs=[
                    pl.BlockSpec((tm, tk), lambda i, j: (i, 0)),   # x
                    pl.BlockSpec((tn, tk), lambda i, j: (j, 0)),   # weight (NT)
                    pl.BlockSpec((1, tn), lambda i, j: (0, j)),    # bias
                ],
                out_specs=pl.BlockSpec((tm, tn), lambda i, j: (i, j)),
            ),
            compiler_params=compiler_params,
            cost_estimate=cost,
        )(x, weight, b2)
    else:
        grid = (mp // tm, np_ // tn, kp // tk)
        compiler_params = pltpu.CompilerParams(
            dimension_semantics=("parallel", "parallel", "arbitrary"),
            vmem_limit_bytes=_VMEM_LIMIT_BYTES,
        )
        out_padded = pl.pallas_call(
            _linear_ksplit_kernel,
            out_shape=jax.ShapeDtypeStruct((mp, np_), out_dtype),
            grid_spec=pltpu.PrefetchScalarGridSpec(
                num_scalar_prefetch=0,
                grid=grid,
                in_specs=[
                    pl.BlockSpec((tm, tk), lambda i, j, k: (i, k)),   # x
                    pl.BlockSpec((tn, tk), lambda i, j, k: (j, k)),   # weight
                    pl.BlockSpec((1, tn), lambda i, j, k: (0, j)),    # bias
                ],
                out_specs=pl.BlockSpec((tm, tn), lambda i, j, k: (i, j)),
                scratch_shapes=[pltpu.VMEM((tm, tn), jnp.float32)],
            ),
            compiler_params=compiler_params,
            cost_estimate=cost,
        )(x, weight, b2)

    return out_padded[:batch, :nclass]


if __name__ == "__main__":
    def make_inputs(key, batch, input_dim, nclass):
        kx, kw, kb = jax.random.split(key, 3)
        x = jax.random.normal(kx, (batch, input_dim), dtype=jnp.float32)
        bound = 1.0 / (input_dim ** 0.5)
        w = jax.random.uniform(kw, (nclass, input_dim), dtype=jnp.float32,
                               minval=-bound, maxval=bound)
        b = jax.random.uniform(kb, (nclass,), dtype=jnp.float32,
                               minval=-bound, maxval=bound)
        return x, w, b

    # 1) Small shapes consistent with the module: single padded (8,128) tile,
    #    fully-fused single-K-step kernel.
    x, w, b = make_inputs(jax.random.PRNGKey(0), batch=8, input_dim=32, nclass=16)
    out = jax.block_until_ready(linear_logsoftmax_forward(x, w, b))
    ref = x @ w.T + b
    assert out.shape == (8, 16)
    assert jnp.allclose(out, ref, atol=2e-2, rtol=2e-2), "small-shape mismatch"

    # 2) Non-aligned shapes: exercises balanced tiling + the megacore M-split
    #    (grid (2,1)), still single K step.
    x2, w2, b2 = make_inputs(jax.random.PRNGKey(1),
                             batch=300, input_dim=640, nclass=272)
    out2 = jax.block_until_ready(linear_logsoftmax_forward(x2, w2, b2))
    ref2 = x2 @ w2.T + b2
    assert out2.shape == (300, 272)
    assert jnp.allclose(out2, ref2, atol=2e-2, rtol=2e-2), "balanced-tile mismatch"

    # 3) Force the K-split accumulator path by shrinking the VMEM budget
    #    (same code path large-K inputs would take).
    x3, w3, b3 = make_inputs(jax.random.PRNGKey(2),
                             batch=64, input_dim=1024, nclass=256)
    out3 = jax.block_until_ready(
        linear_logsoftmax_forward(x3, w3, b3, vmem_budget_bytes=1 << 20))
    ref3 = x3 @ w3.T + b3
    assert out3.shape == (64, 256)
    assert jnp.allclose(out3, ref3, atol=2e-2, rtol=2e-2), "k-split mismatch"

    # 4) bf16 operand path (f32 accumulation): halves HBM traffic on v5e/v6e,
    #    looser tolerance because of operand rounding.
    x4, w4, b4 = make_inputs(jax.random.PRNGKey(3),
                             batch=32, input_dim=256, nclass=128)
    out4 = jax.block_until_ready(
        linear_logsoftmax_forward(x4, w4, b4, compute_dtype=jnp.bfloat16))
    ref4 = x4 @ w4.T + b4
    assert out4.shape == (32, 128)
    assert jnp.allclose(out4, ref4, atol=1e-1, rtol=1e-1), "bf16 mismatch"

    print("KERNEL_OK")
</pallas_src>

<mosaic_0001>
module attributes {stable_mosaic.version = 11 : i64} {
  func.func @_linear_fused_kernel(%arg0: i32, %arg1: i32, %arg2: memref<8x128xf32, #tpu.memory_space<vmem>>, %arg3: memref<128x128xf32, #tpu.memory_space<vmem>>, %arg4: memref<1x128xf32, #tpu.memory_space<vmem>>, %arg5: memref<8x128xf32, #tpu.memory_space<vmem>>) attributes {dimension_semantics = [#tpu.dimension_semantics<parallel>, #tpu.dimension_semantics<parallel>], iteration_bounds = array<i64: 1, 1>, scalar_prefetch = 0 : i64, scratch_operands = 0 : i64, tpu.core_type = #tpu.core_type<tc>, window_params = [{transform_indices = @transform_0, window_bounds = array<i64: 8, 128>}, {transform_indices = @transform_1, window_bounds = array<i64: 128, 128>}, {transform_indices = @transform_2, window_bounds = array<i64: 1, 128>}, {transform_indices = @transform_3, window_bounds = array<i64: 8, 128>}]} {
    %c0 = arith.constant 0 : index
    %c0_0 = arith.constant 0 : index
    %0 = vector.load %arg2[%c0, %c0_0] : memref<8x128xf32, #tpu.memory_space<vmem>>, vector<8x128xf32>
    %c0_1 = arith.constant 0 : index
    %c0_2 = arith.constant 0 : index
    %1 = vector.load %arg3[%c0_1, %c0_2] : memref<128x128xf32, #tpu.memory_space<vmem>>, vector<128x128xf32>
    %cst = arith.constant dense<0.000000e+00> : vector<8x128xf32>
    %2 = tpu.matmul %0, %1, %cst {dimension_numbers = #tpu.dot_dimension_numbers<[1], [1], [0], [0], [0, 0, 1, 0], [], []>} : vector<8x128xf32>, vector<128x128xf32>, vector<8x128xf32> -> vector<8x128xf32>
    %c0_3 = arith.constant 0 : index
    %c0_4 = arith.constant 0 : index
    %3 = vector.load %arg4[%c0_3, %c0_4] : memref<1x128xf32, #tpu.memory_space<vmem>>, vector<1x128xf32>
    %4 = vector.broadcast %3 : vector<1x128xf32> to vector<8x128xf32>
    %5 = arith.addf %2, %4 : vector<8x128xf32>
    %c0_5 = arith.constant 0 : index
    %c0_6 = arith.constant 0 : index
    %6 = vector.load %arg5[%c0_5, %c0_6] : memref<8x128xf32, #tpu.memory_space<vmem>>, vector<8x128xf32>
    tpu.vector_store %arg5[%c0_5, %c0_6], %5 {strides = array<i32>} : memref<8x128xf32, #tpu.memory_space<vmem>>, vector<8x128xf32>,
    return
  }
  func.func @transform_0(%arg0: i32, %arg1: i32) -> (i32, i32) {
    %c0_i32 = arith.constant 0 : i32
    %c0_i32_0 = arith.constant 0 : i32
    return %arg0, %c0_i32 : i32, i32
  }
  func.func @transform_1(%arg0: i32, %arg1: i32) -> (i32, i32) {
    %c0_i32 = arith.constant 0 : i32
    %c0_i32_0 = arith.constant 0 : i32
    return %arg1, %c0_i32 : i32, i32
  }
  func.func @transform_2(%arg0: i32, %arg1: i32) -> (i32, i32) {
    %c0_i32 = arith.constant 0 : i32
    %c0_i32_0 = arith.constant 0 : i32
    return %c0_i32, %arg1 : i32, i32
  }
  func.func @transform_3(%arg0: i32, %arg1: i32) -> (i32, i32) {
    %c0_i32 = arith.constant 0 : i32
    return %arg0, %arg1 : i32, i32
  }
}

</mosaic_0001>

<bundles_post_ra>
// kernel: tpu_custom_call.1
= control target key start
LH: loop header
LB: loop body
LE: loop exit
PB: predicated region body
PF: predicated region fallthrough
CT: control target
= control target key end

     0   :  { %8 = vsyncpa [#allocation3], 0  ;;  %s383_s0 = inlined_call_operand.hbm [shape: f32[8,128], index: 0, kind: input, shape index: {}]   ;;  %s384_s1 = inlined_call_operand.hbm [shape: f32[128,128], index: 1, kind: input, shape index: {}]   ;;  %s385_s2 = inlined_call_operand.vmem [shape: f32[1,128], index: 2, kind: input, shape index: {}]   ;;  %s386_s3 = inlined_call_operand.hbm [shape: f32[8,128], index: 3, kind: output, shape index: {}]  }
   0x1   :  { %9 = vsyncpa [#allocation6], 0 }
   0x2   :  { %10 = vsyncpa [#allocation4], 0  ;;  %s309_s12 = smov [#allocation2]   ;;  %s310_s14 = smov [#allocation5]  }
   0x3   :  { %s17_s13 = sshll.u32 %s309_s12, 4  ;;  %s26_s15 = sshll.u32 %s310_s14, 4  ;;  %s18_s13 = int_to_ptr.vmem [resolvable:$true] %s17_s13  ;;  %s337_s15 = int_to_ptr.vmem [resolvable:$true] %s26_s15 }
   0x4   :  { %s237_s18 = scalar_lea.hbm %s383_s0, 128 }
   0x5   :  { %p238_p0 = scmp.ne.s32.totalorder %s383_s0, %s237_s18  ;;  %p241_p1 = scmp.lt.u32.totalorder %s237_s18, %s383_s0 }
   0x7   :  { %p243_p2 = pnand %p241_p1, %p238_p0 }
   0x9   :  { %246 = shalt.err (!%p243_p2)
}
   0xa   :  { %s247_s23 = scalar_lea.vmem %s18_s13, 128  ;;  %p252_p4 = scmp.lt.s32.totalorder %s18_s13, %s18_s13 }
   0xb   :  { %p248_p3 = scmp.ne.s32.totalorder %s18_s13, %s247_s23  ;;  %p253_p5 = scmp.lt.s32.totalorder %s247_s23, %s247_s23 }
   0xd   :  { %p254_p6 = por %p253_p5, %p252_p4 }
   0xf   :  { %p255_p7 = pnand %p254_p6, %p248_p3 }
  0x11   :  { %258 = shalt.err (!%p255_p7)
}
  0x12   :  { %20 = dma.hbm_to_vmem [thread:$0]  %s383_s0, 128, %s18_s13, [#allocation3]  }
  0x13   :  { %s259_s28 = scalar_lea.hbm %s384_s1, 2048 }
  0x14   :  { %p260_p8 = scmp.ne.s32.totalorder %s384_s1, %s259_s28  ;;  %p263_p9 = scmp.lt.u32.totalorder %s259_s28, %s384_s1 }
  0x16   :  { %p265_p10 = pnand %p263_p9, %p260_p8 }
  0x18   :  { %268 = shalt.err (!%p265_p10)
}
  0x19   :  { %s269_s6 = scalar_lea.vmem %s337_s15, 2048  ;;  %p274_p12 = scmp.lt.s32.totalorder %s337_s15, %s337_s15 }
  0x1a   :  { %p270_p11 = scmp.ne.s32.totalorder %s337_s15, %s269_s6  ;;  %p275_p13 = scmp.lt.s32.totalorder %s269_s6, %s269_s6 }
  0x1c   :  { %p276_p0 = por %p275_p13, %p274_p12 }
  0x1e   :  { %p277_p1 = pnand %p276_p0, %p270_p11 }
  0x20   :  { %280 = shalt.err (!%p277_p1)
}
  0x21   :  { %s311_s0 = smov 128   ;;  %s312_s7 = smov 8  }
  0x22   :  { %32 = dma.hbm_to_vmem [thread:$0]  %s384_s1, 2048, %s337_s15, [#allocation6], %s311_s0, %s311_s0, %s312_s7  }
  0x23   :  { %303 = dma.done.wait [#allocation3], 128  }
  0x24   :  { %304 = vsyncadd [#allocation3], 4294967168 }
  0x25   :  { %305 = dma.done.wait [#allocation6], 2048  }
  0x26   :  { %306 = vsyncadd [#allocation6], 4294965248  ;;  %v313_v0 = vmov 0.0|0.0   ;;  %vm314_vm0 = vmmov 0   ;;  %v315_v1 = vmov 0.0   ;;  %v42_v2 = vld [vmem:[#allocation5] sm:$0xff] }
  0x27   :  { %205 = vmatprep.subr.bf16.mxu0 %v313_v0  ;;  %202 = vmatprep.mubr.msk.f32.mxu0 %vm314_vm0, %v315_v1  ;;  %v43_v3 = vld [vmem:[#allocation5 + $0x8] sm:$0xff]  ;;  %v44_v5 = vld [vmem:[#allocation5 + $0x10] sm:$0xff]  ;;  %v45_v6 = vld [vmem:[#allocation5 + $0x18] sm:$0xff]  ;;  %s316_s11 = smov [#allocation7]  }
  0x28   :  { %v206_v4 = vpack.c.bf16 %v43_v3, %v42_v2  ;;  %v209_v7 = vpack.c.bf16 %v45_v6, %v44_v5  ;;  %v46_v8 = vld [vmem:[#allocation5 + $0x20] sm:$0xff]  ;;  %v47_v9 = vld [vmem:[#allocation5 + $0x28] sm:$0xff]  ;;  %v48_v11 = vld [vmem:[#allocation5 + $0x30] sm:$0xff]  ;;  %s142_s12 = sshll.u32 %s316_s11, 4  ;;  %s143_s12 = int_to_ptr.vmem [resolvable:$true] %s142_s12 }
  0x29   :  { %v212_v10 = vpack.c.bf16 %v47_v9, %v46_v8  ;;  %v49_v12 = vld [vmem:[#allocation5 + $0x38] sm:$0xff]  ;;  %v50_v14 = vld [vmem:[#allocation5 + $0x40] sm:$0xff]  ;;  %v51_v15 = vld [vmem:[#allocation5 + $0x48] sm:$0xff]  ;;  %s281_s13 = scalar_lea.vmem %s143_s12, 128  ;;  %p286_p3 = scmp.lt.s32.totalorder %s143_s12, %s143_s12 }
  0x2a   :  { %207 = vmatpush3.bf16.xpose.msra.mxu0 %v206_v4  ;;  %v215_v13 = vpack.c.bf16 %v49_v12, %v48_v11  ;;  %v218_v16 = vpack.c.bf16 %v51_v15, %v50_v14  ;;  %v52_v17 = vld [vmem:[#allocation5 + $0x50] sm:$0xff]  ;;  %v53_v18 = vld [vmem:[#allocation5 + $0x58] sm:$0xff]  ;;  %v54_v20 = vld [vmem:[#allocation5 + $0x60] sm:$0xff]  ;;  %p282_p2 = scmp.ne.s32.totalorder %s143_s12, %s281_s13  ;;  %p287_p4 = scmp.lt.s32.totalorder %s281_s13, %s281_s13 }
  0x2b   :  { %208 = vmatprep.subr.bf16.mxu0 %v313_v0  ;;  %v221_v19 = vpack.c.bf16 %v53_v18, %v52_v17  ;;  %v55_v21 = vld [vmem:[#allocation5 + $0x68] sm:$0xff]  ;;  %v56_v23 = vld [vmem:[#allocation5 + $0x70] sm:$0xff]  ;;  %v57_v24 = vld [vmem:[#allocation5 + $0x78] sm:$0xff] }
  0x2c   :  { %v224_v22 = vpack.c.bf16 %v55_v21, %v54_v20  ;;  %v227_v25 = vpack.c.bf16 %v57_v24, %v56_v23  ;;  %v41_v26 = vld [vmem:[#allocation2] sm:$0xff]  ;;  %p288_p5 = por %p287_p4, %p286_p3 }
  0x2d   :  { %v152_v27 = vld [vmem:[%s385_s2] ss:$0 sm:$0xff] }
  0x2e   :  { %p289_p6 = pnand %p288_p5, %p282_p2 }
  0x32   :  { %210 = vmatpush3.bf16.xpose.msra.mxu0 %v209_v7 }
  0x33   :  { %211 = vmatprep.subr.bf16.mxu0 %v313_v0 }
  0x3a   :  { %213 = vmatpush3.bf16.xpose.msra.mxu0 %v212_v10 }
  0x3b   :  { %214 = vmatprep.subr.bf16.mxu0 %v313_v0 }
  0x42   :  { %216 = vmatpush3.bf16.xpose.msra.mxu0 %v215_v13 }
  0x43   :  { %217 = vmatprep.subr.bf16.mxu0 %v313_v0 }
  0x4a   :  { %219 = vmatpush3.bf16.xpose.msra.mxu0 %v218_v16 }
  0x4b   :  { %220 = vmatprep.subr.bf16.mxu0 %v313_v0 }
  0x52   :  { %222 = vmatpush3.bf16.xpose.msra.mxu0 %v221_v19 }
  0x53   :  { %223 = vmatprep.subr.bf16.mxu0 %v313_v0 }
  0x5a   :  { %225 = vmatpush3.bf16.xpose.msra.mxu0 %v224_v22 }
  0x5b   :  { %226 = vmatprep.subr.bf16.mxu0 %v313_v0 }
  0x62   :  { %228 = vmatpush3.bf16.xpose.msra.mxu0 %v227_v25 }
  0x69   :  { %203 = vmatmul.mubr.f32.vlgmr.msra.gmra.mrb[0].mxu0 %v41_v26 }
 0x13c   :  { %v131_v28 = vpop.f32.mrb[0].mxu0 }
 0x13d   :  { %v132_v29 = vadd.f32 %v152_v27, %v131_v28  ;;  %v204_v30 = vpop.f32.mrb[1].mxu0 }
 0x13f   :  { %135 = vst [vmem:[#allocation7] sm:$0xff] %v132_v29 }
 0x140   :  { %292 = shalt.err (!%p289_p6)
}
 0x141   :  { %s293_s16 = scalar_lea.hbm %s386_s3, 128 }
 0x142   :  { %p294_p7 = scmp.ne.s32.totalorder %s386_s3, %s293_s16  ;;  %p297_p8 = scmp.lt.u32.totalorder %s293_s16, %s386_s3 }
 0x144   :  { %p299_p9 = pnand %p297_p8, %p294_p7 }
 0x146   :  { %302 = shalt.err (!%p299_p9)
}
 0x147   :  { %145 = dma.vmem_to_hbm [thread:$0]  %s143_s12, 128, %s386_s3, [#allocation4]  }
 0x148   :  { %307 = dma.done.wait [#allocation4], 128  }
 0x149   :  { %308 = vsyncadd [#allocation4], 4294967168 }
 0x14a   :  { %149 = vsyncpa [#allocation3], 1 }
 0x14b   :  { %150 = vsyncpa [#allocation6], 1 }
 0x14c   :  { %151 = vsyncpa [#allocation4], 1 }

</bundles_post_ra>
